<compile_context>
chip_gen: v7x
topology: tpu7x:2x2x1
jax: 0.10.0
libtpu: 0.0.40
codegen_flags: <defaults>
</compile_context>

<pallas_src>
import jax
import jax.numpy as jnp
from jax.experimental import pallas as pl
from jax.experimental.pallas import tpu as pltpu

INPUT_SIZE = 128
HIDDEN_SIZE = 64
OUTPUT_SIZE = 10


def mlp_kernel(x_ref, w1_ref, b1_ref, w2_ref, b2_ref, o_ref):
    # fc1: [TB, in] @ [in, hid], accumulate in f32 on the MXU.
    h = jnp.dot(x_ref[...], w1_ref[...], preferred_element_type=jnp.float32)
    # bias + ReLU in f32 on the VPU (v5e has no bf16 VPU path; VPU is not the
    # bottleneck anyway).
    h = jnp.maximum(h + b1_ref[...], 0.0)
    # fc2: [TB, hid] @ [hid, out] + [1, out]
    y = jnp.dot(h, w2_ref[...], preferred_element_type=jnp.float32)
    o_ref[...] = (y + b2_ref[...]).astype(o_ref.dtype)


def audio_mlp(x, w1, b1, w2, b2, *, block_batch=2048, use_bf16_inputs=False):
    """x: [B, INPUT_SIZE]; w1: [INPUT_SIZE, HIDDEN_SIZE]; b1: [1, HIDDEN_SIZE];
    w2: [HIDDEN_SIZE, OUTPUT_SIZE]; b2: [1, OUTPUT_SIZE]."""
    B = x.shape[0]
    out_dtype = x.dtype

    # Optional reduced-precision input path (opt-in): halves the dominant x
    # HBM stream; accumulation stays f32 inside the kernel.
    if use_bf16_inputs:
        x = x.astype(jnp.bfloat16)
        w1 = w1.astype(jnp.bfloat16)

    # Batch tile: multiple of 8 (sublane), capped so the grid has >=2 steps
    # whenever B allows it (keeps both v7x TensorCores busy).
    half = ((pl.cdiv(B, 2) + 7) // 8) * 8
    TB = max(8, min(block_batch, half))
    grid = (pl.cdiv(B, TB),)

    weight_bytes = (w1.dtype.itemsize * INPUT_SIZE * HIDDEN_SIZE
                    + 4 * HIDDEN_SIZE
                    + 4 * HIDDEN_SIZE * OUTPUT_SIZE
                    + 4 * OUTPUT_SIZE)
    cost = pl.CostEstimate(
        flops=2 * B * (INPUT_SIZE * HIDDEN_SIZE + HIDDEN_SIZE * OUTPUT_SIZE),
        transcendentals=0,
        bytes_accessed=(x.dtype.itemsize * B * INPUT_SIZE
                        + jnp.dtype(out_dtype).itemsize * B * OUTPUT_SIZE
                        + weight_bytes),
    )

    return pl.pallas_call(
        mlp_kernel,
        out_shape=jax.ShapeDtypeStruct((B, OUTPUT_SIZE), out_dtype),
        grid=grid,
        in_specs=[
            # x: tiled over the batch axis (partial last block is fine: the
            # compute is row-independent and OOB output rows are masked).
            pl.BlockSpec((TB, INPUT_SIZE), lambda i: (i, 0)),
            # Weights / biases: constant block index -> VMEM-resident, no re-DMA.
            pl.BlockSpec((INPUT_SIZE, HIDDEN_SIZE), lambda i: (0, 0)),
            pl.BlockSpec((1, HIDDEN_SIZE), lambda i: (0, 0)),
            pl.BlockSpec((HIDDEN_SIZE, OUTPUT_SIZE), lambda i: (0, 0)),
            pl.BlockSpec((1, OUTPUT_SIZE), lambda i: (0, 0)),
        ],
        out_specs=pl.BlockSpec((TB, OUTPUT_SIZE), lambda i: (i, 0)),
        compiler_params=pltpu.CompilerParams(
            # Batch tiles are fully independent -> parallel (2 TCs on v7x).
            dimension_semantics=("parallel",),
        ),
        cost_estimate=cost,
    )(x, w1, b1, w2, b2)


def init_params(key):
    # Deterministic init mimicking nn.Linear's uniform(-1/sqrt(fan_in), ...).
    k1, k2, k3, k4 = jax.random.split(key, 4)
    bound1 = 1.0 / (INPUT_SIZE ** 0.5)
    bound2 = 1.0 / (HIDDEN_SIZE ** 0.5)
    w1 = jax.random.uniform(k1, (INPUT_SIZE, HIDDEN_SIZE), jnp.float32,
                            minval=-bound1, maxval=bound1)
    b1 = jax.random.uniform(k2, (1, HIDDEN_SIZE), jnp.float32,
                            minval=-bound1, maxval=bound1)
    w2 = jax.random.uniform(k3, (HIDDEN_SIZE, OUTPUT_SIZE), jnp.float32,
                            minval=-bound2, maxval=bound2)
    b2 = jax.random.uniform(k4, (1, OUTPUT_SIZE), jnp.float32,
                            minval=-bound2, maxval=bound2)
    return w1, b1, w2, b2


def reference(x, w1, b1, w2, b2):
    h = jnp.maximum(x @ w1 + b1, 0.0)
    return h @ w2 + b2


if __name__ == "__main__":
    key = jax.random.PRNGKey(0)
    kx, kp, kx2 = jax.random.split(key, 3)
    w1, b1, w2, b2 = init_params(kp)

    # Small batch: single grid step.
    batch = 8
    x = jax.random.normal(kx, (batch, INPUT_SIZE), jnp.float32)
    out = jax.block_until_ready(audio_mlp(x, w1, b1, w2, b2))
    ref = reference(x, w1, b1, w2, b2)
    assert out.shape == (batch, OUTPUT_SIZE)
    assert jnp.allclose(out, ref, atol=1e-5, rtol=1e-5)

    # Exercise the multi-step + partial-last-block path (no host padding):
    # B=40, TB=16 -> grid=3 with a 8-row tail handled by Pallas masking.
    batch2 = 40
    x2 = jax.random.normal(kx2, (batch2, INPUT_SIZE), jnp.float32)
    out2 = jax.block_until_ready(audio_mlp(x2, w1, b1, w2, b2, block_batch=16))
    ref2 = reference(x2, w1, b1, w2, b2)
    assert out2.shape == (batch2, OUTPUT_SIZE)
    assert jnp.allclose(out2, ref2, atol=1e-5, rtol=1e-5)

    # Opt-in bf16 input path (v6e/v7x mem-bound win); loose tolerance vs f32 ref.
    out3 = jax.block_until_ready(
        audio_mlp(x2, w1, b1, w2, b2, block_batch=16, use_bf16_inputs=True))
    assert out3.shape == (batch2, OUTPUT_SIZE)
    assert jnp.allclose(out3, ref2, atol=1e-1, rtol=1e-1)

    print("KERNEL_OK")
</pallas_src>

<mosaic_0001>
module attributes {stable_mosaic.version = 11 : i64} {
  func.func @mlp_kernel(%arg0: i32, %arg1: memref<8x128xf32, #tpu.memory_space<vmem>>, %arg2: memref<128x64xf32, #tpu.memory_space<vmem>>, %arg3: memref<1x64xf32, #tpu.memory_space<vmem>>, %arg4: memref<64x10xf32, #tpu.memory_space<vmem>>, %arg5: memref<1x10xf32, #tpu.memory_space<vmem>>, %arg6: memref<8x10xf32, #tpu.memory_space<vmem>>) attributes {dimension_semantics = [#tpu.dimension_semantics<parallel>], iteration_bounds = array<i64: 1>, scalar_prefetch = 0 : i64, scratch_operands = 0 : i64, tpu.core_type = #tpu.core_type<tc>, window_params = [{transform_indices = @transform_0, window_bounds = array<i64: 8, 128>}, {pipeline_mode = #tpu.pipeline_mode<synchronous>, transform_indices = @transform_1, window_bounds = array<i64: 128, 64>}, {pipeline_mode = #tpu.pipeline_mode<synchronous>, transform_indices = @transform_2, window_bounds = array<i64: 1, 64>}, {pipeline_mode = #tpu.pipeline_mode<synchronous>, transform_indices = @transform_3, window_bounds = array<i64: 64, 10>}, {pipeline_mode = #tpu.pipeline_mode<synchronous>, transform_indices = @transform_4, window_bounds = array<i64: 1, 10>}, {transform_indices = @transform_5, window_bounds = array<i64: 8, 10>}]} {
    %c0 = arith.constant 0 : index
    %c0_0 = arith.constant 0 : index
    %0 = vector.load %arg1[%c0, %c0_0] : memref<8x128xf32, #tpu.memory_space<vmem>>, vector<8x128xf32>
    %c0_1 = arith.constant 0 : index
    %c0_2 = arith.constant 0 : index
    %1 = vector.load %arg2[%c0_1, %c0_2] : memref<128x64xf32, #tpu.memory_space<vmem>>, vector<128x64xf32>
    %cst = arith.constant dense<0.000000e+00> : vector<8x64xf32>
    %2 = tpu.matmul %0, %1, %cst {dimension_numbers = #tpu.dot_dimension_numbers<[1], [0], [0], [1], [0, 0, 1, 1], [], []>} : vector<8x128xf32>, vector<128x64xf32>, vector<8x64xf32> -> vector<8x64xf32>
    %c0_3 = arith.constant 0 : index
    %c0_4 = arith.constant 0 : index
    %3 = vector.load %arg3[%c0_3, %c0_4] : memref<1x64xf32, #tpu.memory_space<vmem>>, vector<1x64xf32>
    %4 = vector.broadcast %3 : vector<1x64xf32> to vector<8x64xf32>
    %5 = arith.addf %2, %4 : vector<8x64xf32>
    %cst_5 = arith.constant 0.000000e+00 : f32
    %6 = vector.broadcast %cst_5 : f32 to vector<8x64xf32>
    %7 = arith.maximumf %5, %6 : vector<8x64xf32>
    %c0_6 = arith.constant 0 : index
    %c0_7 = arith.constant 0 : index
    %8 = vector.load %arg4[%c0_6, %c0_7] : memref<64x10xf32, #tpu.memory_space<vmem>>, vector<64x10xf32>
    %cst_8 = arith.constant dense<0.000000e+00> : vector<8x10xf32>
    %9 = tpu.matmul %7, %8, %cst_8 {dimension_numbers = #tpu.dot_dimension_numbers<[1], [0], [0], [1], [0, 0, 1, 1], [], []>} : vector<8x64xf32>, vector<64x10xf32>, vector<8x10xf32> -> vector<8x10xf32>
    %c0_9 = arith.constant 0 : index
    %c0_10 = arith.constant 0 : index
    %10 = vector.load %arg5[%c0_9, %c0_10] : memref<1x10xf32, #tpu.memory_space<vmem>>, vector<1x10xf32>
    %11 = vector.broadcast %10 : vector<1x10xf32> to vector<8x10xf32>
    %12 = arith.addf %9, %11 : vector<8x10xf32>
    %c0_11 = arith.constant 0 : index
    %c0_12 = arith.constant 0 : index
    %13 = vector.load %arg6[%c0_11, %c0_12] : memref<8x10xf32, #tpu.memory_space<vmem>>, vector<8x10xf32>
    tpu.vector_store %arg6[%c0_11, %c0_12], %12 {strides = array<i32>} : memref<8x10xf32, #tpu.memory_space<vmem>>, vector<8x10xf32>,
    return
  }
  func.func @transform_0(%arg0: i32) -> (i32, i32) {
    %c0_i32 = arith.constant 0 : i32
    %c0_i32_0 = arith.constant 0 : i32
    return %arg0, %c0_i32 : i32, i32
  }
  func.func @transform_1(%arg0: i32) -> (i32, i32) {
    %c0_i32 = arith.constant 0 : i32
    %c0_i32_0 = arith.constant 0 : i32
    %c0_i32_1 = arith.constant 0 : i32
    return %c0_i32, %c0_i32_0 : i32, i32
  }
  func.func @transform_2(%arg0: i32) -> (i32, i32) {
    %c0_i32 = arith.constant 0 : i32
    %c0_i32_0 = arith.constant 0 : i32
    %c0_i32_1 = arith.constant 0 : i32
    return %c0_i32, %c0_i32_0 : i32, i32
  }
  func.func @transform_3(%arg0: i32) -> (i32, i32) {
    %c0_i32 = arith.constant 0 : i32
    %c0_i32_0 = arith.constant 0 : i32
    %c0_i32_1 = arith.constant 0 : i32
    return %c0_i32, %c0_i32_0 : i32, i32
  }
  func.func @transform_4(%arg0: i32) -> (i32, i32) {
    %c0_i32 = arith.constant 0 : i32
    %c0_i32_0 = arith.constant 0 : i32
    %c0_i32_1 = arith.constant 0 : i32
    return %c0_i32, %c0_i32_0 : i32, i32
  }
  func.func @transform_5(%arg0: i32) -> (i32, i32) {
    %c0_i32 = arith.constant 0 : i32
    %c0_i32_0 = arith.constant 0 : i32
    return %arg0, %c0_i32 : i32, i32
  }
}

</mosaic_0001>

<bundles_post_ra>
// kernel: tpu_custom_call.1
= control target key start
LH: loop header
LB: loop body
LE: loop exit
PB: predicated region body
PF: predicated region fallthrough
CT: control target
= control target key end

     0   :  { %v368_v3 = vmov 0.0|0.0   ;;  %vm369_vm0 = vmmov 0   ;;  %v370_v6 = vmov 0.0   ;;  %s495_s0 = inlined_call_operand.vmem [shape: f32[8,128], index: 0, kind: input, shape index: {}]   ;;  %s496_s1 = inlined_call_operand.vmem [shape: f32[128,64], index: 1, kind: input, shape index: {}]   ;;  %s497_s2 = inlined_call_operand.vmem [shape: f32[1,64], index: 2, kind: input, shape index: {}]   ;;  %s498_s3 = inlined_call_operand.vmem [shape: f32[64,10], index: 3, kind: input, shape index: {}]   ;;  %s499_s4 = inlined_call_operand.vmem [shape: f32[1,10], index: 4, kind: input, shape index: {}]   ;;  %s500_s5 = inlined_call_operand.hbm [shape: f32[8,10], index: 5, kind: output, shape index: {}]  }
   0x1   :  { %v22_v0 = vld [vmem:[%s496_s1] sm:$0xff]  ;;  %v23_v1 = vld [vmem:[%s496_s1 + $0x8] sm:$0xff]  ;;  %v24_v2 = vld [vmem:[%s496_s1 + $0x10] sm:$0xff]  ;;  %304 = vmatprep.subr.bf16.mxu0 %v368_v3  ;;  %282 = vmatprep.mubr.msk.f32.mxu0 %vm369_vm0, %v370_v6 }
   0x2   :  { %v305_v4 = vpack.c.bf16 %v23_v1, %v22_v0  ;;  %v25_v5 = vld [vmem:[%s496_s1 + $0x18] sm:$0xff]  ;;  %328 = vmatprep.subr.bf16.mxu1 %v368_v3  ;;  %301 = vmatprep.mubr.msk.f32.mxu1 %vm369_vm0, %v370_v6  ;;  %v26_v8 = vld [vmem:[%s496_s1 + $0x20] sm:$0xff]  ;;  %v27_v9 = vld [vmem:[%s496_s1 + $0x28] sm:$0xff] }
   0x3   :  { %v308_v7 = vpack.c.bf16 %v25_v5, %v24_v2  ;;  %v116_v10 = vld [vmem:[%s498_s3] sm:$0xff]  ;;  %v117_v11 = vld [vmem:[%s498_s3 + $0x8] sm:$0xff]  ;;  %v118_v12 = vld [vmem:[%s498_s3 + $0x10] sm:$0xff]  ;;  %v311_v14 = vpack.c.bf16 %v27_v9, %v26_v8 }
   0x4   :  { %306 = vmatpush3.bf16.msra.mxu0 %v305_v4  ;;  %v119_v13 = vld [vmem:[%s498_s3 + $0x18] sm:$0xff]  ;;  %v329_v15 = vpack.c.bf16 %v117_v11, %v116_v10  ;;  %v28_v16 = vld [vmem:[%s496_s1 + $0x30] sm:$0xff] }
   0x5   :  { %307 = vmatprep.subr.bf16.mxu0 %v368_v3  ;;  %v29_v17 = vld [vmem:[%s496_s1 + $0x38] sm:$0xff] }
   0x8   :  { %309 = vmatpush3.bf16.msra.mxu0 %v308_v7 }
   0x9   :  { %310 = vmatprep.subr.bf16.mxu0 %v368_v3 }
   0xa   :  { %10 = vsyncpa [#allocation3], 0  ;;  %330 = vmatpush3.bf16.msra.mxu1 %v329_v15  ;;  %v332_v18 = vpack.c.bf16 %v119_v13, %v118_v12  ;;  %v120_v19 = vld [vmem:[%s498_s3 + $0x20] sm:$0xff]  ;;  %v121_v20 = vld [vmem:[%s498_s3 + $0x28] sm:$0xff]  ;;  %v314_v21 = vpack.c.bf16 %v29_v17, %v28_v16  ;;  %vm131_vm1 = vcmask 523264   ;;  %s371_s20 = smov [#allocation2]  }
   0xb   :  { %331 = vmatprep.subr.bf16.mxu1 %v368_v3  ;;  %v30_v22 = vld [vmem:[%s496_s1 + $0x40] sm:$0xff]  ;;  %v31_v23 = vld [vmem:[%s496_s1 + $0x48] sm:$0xff]  ;;  %v335_v24 = vpack.c.bf16 %v121_v20, %v120_v19  ;;  %v32_v26 = vld [vmem:[%s496_s1 + $0x50] sm:$0xff]  ;;  %s213_s21 = sshll.u32 %s371_s20, 4  ;;  %vm205_vm2 = vcmask 80896   ;;  %s214_s21 = int_to_ptr.vmem [resolvable:$true] %s213_s21 }
   0xc   :  { %312 = vmatpush3.bf16.msra.mxu0 %v311_v14  ;;  %v317_v25 = vpack.c.bf16 %v31_v23, %v30_v22  ;;  %v33_v27 = vld [vmem:[%s496_s1 + $0x58] sm:$0xff]  ;;  %v34_v29 = vld [vmem:[%s496_s1 + $0x60] sm:$0xff]  ;;  %v35_v30 = vld [vmem:[%s496_s1 + $0x68] sm:$0xff]  ;;  %p349_p1 = scmp.lt.s32.totalorder %s214_s21, %s214_s21 }
   0xd   :  { %313 = vmatprep.subr.bf16.mxu0 %v368_v3  ;;  %v320_v28 = vpack.c.bf16 %v33_v27, %v32_v26  ;;  %v323_v31 = vpack.c.bf16 %v35_v30, %v34_v29  ;;  %v36_v32 = vld [vmem:[%s496_s1 + $0x70] sm:$0xff]  ;;  %v37_v33 = vld [vmem:[%s496_s1 + $0x78] sm:$0xff]  ;;  %v21_v35 = vld [vmem:[%s495_s0] sm:$0xff] }
   0xe   :  { %333 = vmatpush3.bf16.msra.mxu1 %v332_v18  ;;  %v326_v34 = vpack.c.bf16 %v37_v33, %v36_v32  ;;  %v122_v36 = vld [vmem:[%s498_s3 + $0x30] sm:$0xff]  ;;  %v123_v37 = vld [vmem:[%s498_s3 + $0x38] sm:$0xff]  ;;  %v221_v39 = vld [vmem:[%s497_s2] ss:$0 sm:$0xff]  ;;  %s344_s3 = scalar_lea.vmem %s214_s21, 128 }
   0xf   :  { %334 = vmatprep.subr.bf16.mxu1 %v368_v3  ;;  %v338_v38 = vpack.c.bf16 %v123_v37, %v122_v36  ;;  %v222_v44 = vld [vmem:[%s499_s4] ss:$0 sm:$0xff]  ;;  %p345_p0 = scmp.ne.s32.totalorder %s214_s21, %s344_s3  ;;  %p350_p2 = scmp.lt.s32.totalorder %s344_s3, %s344_s3 }
  0x10   :  { %315 = vmatpush3.bf16.msra.mxu0 %v314_v21 }
  0x11   :  { %316 = vmatprep.subr.bf16.mxu0 %v368_v3  ;;  %p351_p3 = por %p350_p2, %p349_p1 }
  0x12   :  { %336 = vmatpush3.bf16.msra.mxu1 %v335_v24 }
  0x13   :  { %337 = vmatprep.subr.bf16.mxu1 %v368_v3  ;;  %p352_p4 = pnand %p351_p3, %p345_p0 }
  0x14   :  { %318 = vmatpush3.bf16.msra.mxu0 %v317_v25 }
  0x15   :  { %319 = vmatprep.subr.bf16.mxu0 %v368_v3 }
  0x16   :  { %339 = vmatpush3.bf16.msra.mxu1 %v338_v38 }
  0x18   :  { %321 = vmatpush3.bf16.msra.mxu0 %v320_v28 }
  0x19   :  { %322 = vmatprep.subr.bf16.mxu0 %v368_v3 }
  0x1c   :  { %324 = vmatpush3.bf16.msra.mxu0 %v323_v31 }
  0x1d   :  { %325 = vmatprep.subr.bf16.mxu0 %v368_v3 }
  0x20   :  { %327 = vmatpush3.bf16.msra.mxu0 %v326_v34 }
  0x23   :  { %283 = vmatmul.mubr.f32.vlgmr.msra.gmra.mrb[0].mxu0 %v21_v35 }
  0xf6   :  { %v111_v40 = vpop.f32.mrb[0].mxu0 }
  0xf7   :  { %v112_v41 = vadd.f32 %v221_v39, %v111_v40  ;;  %v284_v42 = vpop.f32.mrb[1].mxu0 }
  0xf9   :  { %v115_v43 = vmax.f32 %v112_v41, 0.0 }
  0xfb   :  { %302 = vmatmul.mubr.msk.f32.vlgmr.msra.gmra.mrb[0].mxu1 %vm131_vm1, %v115_v43 }
 0x1ce   :  { %v201_v45 = vpop.f32.mrb[0].mxu1 }
 0x1cf   :  { %v202_v46 = vadd.f32 %v222_v44, %v201_v45  ;;  %v303_v47 = vpop.f32.mrb[1].mxu1 }
 0x1d1   :  { %206 = vst.msk [vmem:[#allocation2] sm:$0xff] %vm205_vm2, %v202_v46 }
 0x1d2   :  { %355 = shalt.err (!%p352_p4)
}
 0x1d3   :  { %s356_s23 = scalar_lea.hbm %s500_s5, 128 }
 0x1d4   :  { %p357_p5 = scmp.ne.s32.totalorder %s500_s5, %s356_s23  ;;  %p360_p6 = scmp.lt.u32.totalorder %s356_s23, %s500_s5 }
 0x1d6   :  { %p362_p7 = pnand %p360_p6, %p357_p5 }
 0x1d8   :  { %365 = shalt.err (!%p362_p7)
}
 0x1d9   :  { %216 = dma.vmem_to_hbm [thread:$0]  %s214_s21, 128, %s500_s5, [#allocation3]  }
 0x1da   :  { %366 = dma.done.wait [#allocation3], 128  }
 0x1db   :  { %367 = vsyncadd [#allocation3], 4294967168 }
 0x1dc   :  { %220 = vsyncpa [#allocation3], 1 }

</bundles_post_ra>
